<compile_context>
chip_gen: v7x
topology: tpu7x:2x2x1
jax: 0.10.0
libtpu: 0.0.40
codegen_flags: <defaults>
</compile_context>

<pallas_src>
import jax
import jax.numpy as jnp
import numpy as np
from jax.experimental import pallas as pl
from jax.experimental.pallas import tpu as pltpu


def attention_block_kernel(g_ref, x_ref, wg_ref, wx_ref, bgx_ref,
                           wpsi_ref, bpsi_ref, out_ref):
    # g_ref: (Fg, thw) bf16, x_ref: (Fl, thw) bf16 (batch dim squeezed away)
    g = g_ref[...]
    x = x_ref[...]
    # h = relu(Wg @ g + Wx @ x + (bg + bx))  ->  (Fint, thw) in f32
    h = (jnp.dot(wg_ref[...], g, preferred_element_type=jnp.float32)
         + jnp.dot(wx_ref[...], x, preferred_element_type=jnp.float32)
         + bgx_ref[...])
    h = jnp.maximum(h, 0.0)
    # psi: 1x1 conv to 1 channel (+ folded BN) + sigmoid  ->  (1, thw) f32
    psi = jnp.dot(wpsi_ref[...], h, preferred_element_type=jnp.float32) + bpsi_ref[0, 0]
    gate = jax.nn.sigmoid(psi)
    # x * psi, gate broadcast over the channel (sublane) axis; store bf16.
    out_ref[...] = (x.astype(jnp.float32) * gate).astype(out_ref.dtype)


def _round_up(a, b):
    return ((a + b - 1) // b) * b


def attention_block(g, x, params, *, thw=2048, out_dtype=jnp.bfloat16):
    """g: (N, F_g, H, W), x: (N, F_l, H, W) NCHW. Returns (N, F_l, H, W) in out_dtype."""
    N, Fg, H, W = g.shape
    _, Fl, _, _ = x.shape
    Fint = params["wg"].shape[0]
    HW = H * W

    # Lane tile: multiple of 128, no larger than the (rounded-up) spatial extent.
    thw = max(128, min(_round_up(thw, 128), _round_up(HW, 128)))
    T = pl.cdiv(HW, thw)

    # Free reshapes (NCHW is contiguous in H*W); stream activations as bf16.
    g3 = g.reshape(N, Fg, HW).astype(jnp.bfloat16)
    x3 = x.reshape(N, Fl, HW).astype(jnp.bfloat16)

    # VMEM budget: double-buffered bf16 g/x/out tiles + f32 intermediates + slack.
    est = 4 * thw * (Fg + 2 * Fl) + 8 * thw * (Fint + 2) + (2 << 20)
    vmem_limit = int(min(48 * 2**20, max(16 * 2**20, 2 * est)))

    out = pl.pallas_call(
        attention_block_kernel,
        out_shape=jax.ShapeDtypeStruct((N, Fl, HW), out_dtype),
        grid_spec=pltpu.PrefetchScalarGridSpec(
            num_scalar_prefetch=0,
            grid=(N, T),
            in_specs=[
                pl.BlockSpec((None, Fg, thw), lambda n, t: (n, 0, t)),   # g tile
                pl.BlockSpec((None, Fl, thw), lambda n, t: (n, 0, t)),   # x tile
                pl.BlockSpec((Fint, Fg), lambda n, t: (0, 0)),           # W_g (BN folded, bf16)
                pl.BlockSpec((Fint, Fl), lambda n, t: (0, 0)),           # W_x (BN folded, bf16)
                pl.BlockSpec((Fint, 1), lambda n, t: (0, 0)),            # b_g + b_x (f32)
                pl.BlockSpec((1, Fint), lambda n, t: (0, 0)),            # W_psi (BN folded, f32)
                pl.BlockSpec(memory_space=pltpu.MemorySpace.SMEM),       # b_psi scalar
            ],
            out_specs=pl.BlockSpec((None, Fl, thw), lambda n, t: (n, 0, t)),
        ),
        compiler_params=pltpu.CompilerParams(
            dimension_semantics=("parallel", "parallel"),
            vmem_limit_bytes=vmem_limit),
    )(g3, x3, params["wg"], params["wx"], params["bgx"],
      params["wpsi"], params["bpsi"])

    return out.reshape(N, Fl, H, W)


def _fold_conv_bn(w, b, gamma, beta, mean, var, eps=1e-5):
    """Fold eval-mode BatchNorm into a 1x1 conv expressed as (C_out, C_in) matmul."""
    scale = gamma / jnp.sqrt(var + eps)
    w_eff = w * scale[:, None]
    b_eff = (b - mean) * scale + beta
    return w_eff, b_eff


def make_params(key, F_g, F_l, F_int):
    ks = jax.random.split(key, 9)
    # conv weights in PyTorch-style (C_out, C_in) matmul form; biases: (C_out,)
    wg = jax.random.normal(ks[0], (F_int, F_g)) * 0.1
    bg = jax.random.normal(ks[1], (F_int,)) * 0.1
    wx = jax.random.normal(ks[2], (F_int, F_l)) * 0.1
    bx = jax.random.normal(ks[3], (F_int,)) * 0.1
    wpsi = jax.random.normal(ks[4], (1, F_int)) * 0.1
    bpsi = jax.random.normal(ks[5], (1,)) * 0.1

    # BatchNorm params / running stats (eval mode)
    def bn(k, c):
        k1, k2, k3, k4 = jax.random.split(k, 4)
        gamma = 1.0 + 0.1 * jax.random.normal(k1, (c,))
        beta = 0.1 * jax.random.normal(k2, (c,))
        mean = 0.1 * jax.random.normal(k3, (c,))
        var = 0.5 + jnp.abs(jax.random.normal(k4, (c,)))
        return gamma, beta, mean, var

    wg_e, bg_e = _fold_conv_bn(wg, bg, *bn(ks[6], F_int))
    wx_e, bx_e = _fold_conv_bn(wx, bx, *bn(ks[7], F_int))
    wp_e, bp_e = _fold_conv_bn(wpsi, bpsi, *bn(ks[8], 1))

    return {
        "wg": wg_e.astype(jnp.bfloat16),                               # (Fint, Fg)
        "wx": wx_e.astype(jnp.bfloat16),                               # (Fint, Fl)
        "bgx": (bg_e + bx_e).reshape(F_int, 1).astype(jnp.float32),    # fused pre-ReLU bias
        "wpsi": wp_e.astype(jnp.float32),                              # (1, Fint)
        "bpsi": bp_e.reshape(1, 1).astype(jnp.float32),                # SMEM scalar
    }


def reference(g, x, params):
    """Pure-JAX reference in NCHW, using the same bf16-rounded activations/weights."""
    f32 = jnp.float32
    gb = g.astype(jnp.bfloat16).astype(f32)
    xb = x.astype(jnp.bfloat16).astype(f32)
    wg = params["wg"].astype(f32)
    wx = params["wx"].astype(f32)
    g1 = jnp.einsum("oc,nchw->nohw", wg, gb)
    x1 = jnp.einsum("oc,nchw->nohw", wx, xb)
    h = jnp.maximum(g1 + x1 + params["bgx"].reshape(1, -1, 1, 1), 0.0)
    psi = jnp.einsum("oc,nchw->nohw", params["wpsi"], h) + params["bpsi"].reshape(1, 1, 1, 1)
    gate = jax.nn.sigmoid(psi)
    return xb * gate


if __name__ == "__main__":
    F_g, F_l, F_int = 8, 4, 16
    N, H, W = 2, 16, 16

    key = jax.random.PRNGKey(0)
    kg, kx, kp = jax.random.split(key, 3)
    g = jax.random.normal(kg, (N, F_g, H, W), dtype=jnp.float32)
    x = jax.random.normal(kx, (N, F_l, H, W), dtype=jnp.float32)
    params = make_params(kp, F_g, F_l, F_int)

    out = attention_block(g, x, params)
    out = jax.block_until_ready(out)

    ref = reference(g, x, params)
    np.testing.assert_allclose(np.asarray(out.astype(jnp.float32)),
                               np.asarray(ref), rtol=1e-2, atol=1e-2)
    print("KERNEL_OK")
</pallas_src>

<mosaic_0001>
module attributes {stable_mosaic.version = 11 : i64} {
  func.func @attention_block_kernel(%arg0: i32, %arg1: i32, %arg2: memref<1x8x256xbf16, #tpu.memory_space<vmem>>, %arg3: memref<1x4x256xbf16, #tpu.memory_space<vmem>>, %arg4: memref<16x8xbf16, #tpu.memory_space<vmem>>, %arg5: memref<16x4xbf16, #tpu.memory_space<vmem>>, %arg6: memref<16x1xf32, #tpu.memory_space<vmem>>, %arg7: memref<1x16xf32, #tpu.memory_space<vmem>>, %arg8: memref<1x1xf32, #tpu.memory_space<smem>>, %arg9: memref<1x4x256xbf16, #tpu.memory_space<vmem>>) attributes {dimension_semantics = [#tpu.dimension_semantics<parallel>, #tpu.dimension_semantics<parallel>], iteration_bounds = array<i64: 2, 1>, scalar_prefetch = 0 : i64, scratch_operands = 0 : i64, tpu.core_type = #tpu.core_type<tc>, window_params = [{transform_indices = @transform_0, window_bounds = array<i64: 1, 8, 256>}, {transform_indices = @transform_1, window_bounds = array<i64: 1, 4, 256>}, {pipeline_mode = #tpu.pipeline_mode<synchronous>, transform_indices = @transform_2, window_bounds = array<i64: 16, 8>}, {pipeline_mode = #tpu.pipeline_mode<synchronous>, transform_indices = @transform_3, window_bounds = array<i64: 16, 4>}, {pipeline_mode = #tpu.pipeline_mode<synchronous>, transform_indices = @transform_4, window_bounds = array<i64: 16, 1>}, {pipeline_mode = #tpu.pipeline_mode<synchronous>, transform_indices = @transform_5, window_bounds = array<i64: 1, 16>}, {transform_indices = @transform_6, window_bounds = array<i64: 1, 1>}, {transform_indices = @transform_7, window_bounds = array<i64: 1, 4, 256>}]} {
    %c0 = arith.constant 0 : index
    %c0_0 = arith.constant 0 : index
    %c0_1 = arith.constant 0 : index
    %0 = vector.load %arg2[%c0, %c0_0, %c0_1] : memref<1x8x256xbf16, #tpu.memory_space<vmem>>, vector<1x8x256xbf16>
    %1 = vector.shape_cast %0 : vector<1x8x256xbf16> to vector<8x256xbf16>
    %c0_2 = arith.constant 0 : index
    %c0_3 = arith.constant 0 : index
    %c0_4 = arith.constant 0 : index
    %2 = vector.load %arg3[%c0_2, %c0_3, %c0_4] : memref<1x4x256xbf16, #tpu.memory_space<vmem>>, vector<1x4x256xbf16>
    %3 = vector.shape_cast %2 : vector<1x4x256xbf16> to vector<4x256xbf16>
    %c0_5 = arith.constant 0 : index
    %c0_6 = arith.constant 0 : index
    %4 = vector.load %arg4[%c0_5, %c0_6] : memref<16x8xbf16, #tpu.memory_space<vmem>>, vector<16x8xbf16>
    %cst = arith.constant dense<0.000000e+00> : vector<16x256xf32>
    %5 = tpu.matmul %4, %1, %cst {dimension_numbers = #tpu.dot_dimension_numbers<[1], [0], [0], [1], [0, 0, 1, 1], [], []>} : vector<16x8xbf16>, vector<8x256xbf16>, vector<16x256xf32> -> vector<16x256xf32>
    %c0_7 = arith.constant 0 : index
    %c0_8 = arith.constant 0 : index
    %6 = vector.load %arg5[%c0_7, %c0_8] : memref<16x4xbf16, #tpu.memory_space<vmem>>, vector<16x4xbf16>
    %cst_9 = arith.constant dense<0.000000e+00> : vector<16x256xf32>
    %7 = tpu.matmul %6, %3, %cst_9 {dimension_numbers = #tpu.dot_dimension_numbers<[1], [0], [0], [1], [0, 0, 1, 1], [], []>} : vector<16x4xbf16>, vector<4x256xbf16>, vector<16x256xf32> -> vector<16x256xf32>
    %8 = arith.addf %5, %7 : vector<16x256xf32>
    %c0_10 = arith.constant 0 : index
    %c0_11 = arith.constant 0 : index
    %9 = vector.load %arg6[%c0_10, %c0_11] : memref<16x1xf32, #tpu.memory_space<vmem>>, vector<16x1xf32>
    %10 = vector.broadcast %9 : vector<16x1xf32> to vector<16x256xf32>
    %11 = arith.addf %8, %10 : vector<16x256xf32>
    %cst_12 = arith.constant 0.000000e+00 : f32
    %12 = vector.broadcast %cst_12 : f32 to vector<16x256xf32>
    %13 = arith.maximumf %11, %12 : vector<16x256xf32>
    %c0_13 = arith.constant 0 : index
    %c0_14 = arith.constant 0 : index
    %14 = vector.load %arg7[%c0_13, %c0_14] : memref<1x16xf32, #tpu.memory_space<vmem>>, vector<1x16xf32>
    %cst_15 = arith.constant dense<0.000000e+00> : vector<1x256xf32>
    %15 = tpu.matmul %14, %13, %cst_15 {dimension_numbers = #tpu.dot_dimension_numbers<[1], [0], [0], [1], [0, 0, 1, 1], [], []>} : vector<1x16xf32>, vector<16x256xf32>, vector<1x256xf32> -> vector<1x256xf32>
    %c0_16 = arith.constant 0 : index
    %c0_17 = arith.constant 0 : index
    %16 = memref.load %arg8[%c0_16, %c0_17] : memref<1x1xf32, #tpu.memory_space<smem>>
    %17 = vector.broadcast %16 : f32 to vector<1x256xf32>
    %18 = arith.addf %15, %17 : vector<1x256xf32>
    %19 = arith.negf %18 : vector<1x256xf32>
    %20 = math.exp %19 : vector<1x256xf32>
    %cst_18 = arith.constant 1.000000e+00 : f32
    %21 = vector.broadcast %cst_18 : f32 to vector<1x256xf32>
    %22 = arith.addf %21, %20 : vector<1x256xf32>
    %23 = arith.divf %21, %22 : vector<1x256xf32>
    %24 = arith.extf %3 : vector<4x256xbf16> to vector<4x256xf32>
    %25 = vector.broadcast %23 : vector<1x256xf32> to vector<4x256xf32>
    %26 = arith.mulf %24, %25 : vector<4x256xf32>
    %27 = arith.truncf %26 : vector<4x256xf32> to vector<4x256xbf16>
    %c0_19 = arith.constant 0 : index
    %c0_20 = arith.constant 0 : index
    %c0_21 = arith.constant 0 : index
    %28 = vector.load %arg9[%c0_19, %c0_20, %c0_21] : memref<1x4x256xbf16, #tpu.memory_space<vmem>>, vector<1x4x256xbf16>
    %29 = vector.shape_cast %28 : vector<1x4x256xbf16> to vector<4x256xbf16>
    %30 = vector.shape_cast %27 : vector<4x256xbf16> to vector<1x4x256xbf16>
    tpu.vector_store %arg9[%c0_19, %c0_20, %c0_21], %30 {strides = array<i32>} : memref<1x4x256xbf16, #tpu.memory_space<vmem>>, vector<1x4x256xbf16>,
    return
  }
  func.func @transform_0(%arg0: i32, %arg1: i32) -> (i32, i32, i32) {
    %c0_i32 = arith.constant 0 : i32
    %c0_i32_0 = arith.constant 0 : i32
    return %arg0, %c0_i32, %arg1 : i32, i32, i32
  }
  func.func @transform_1(%arg0: i32, %arg1: i32) -> (i32, i32, i32) {
    %c0_i32 = arith.constant 0 : i32
    %c0_i32_0 = arith.constant 0 : i32
    return %arg0, %c0_i32, %arg1 : i32, i32, i32
  }
  func.func @transform_2(%arg0: i32, %arg1: i32) -> (i32, i32) {
    %c0_i32 = arith.constant 0 : i32
    %c0_i32_0 = arith.constant 0 : i32
    %c0_i32_1 = arith.constant 0 : i32
    return %c0_i32, %c0_i32_0 : i32, i32
  }
  func.func @transform_3(%arg0: i32, %arg1: i32) -> (i32, i32) {
    %c0_i32 = arith.constant 0 : i32
    %c0_i32_0 = arith.constant 0 : i32
    %c0_i32_1 = arith.constant 0 : i32
    return %c0_i32, %c0_i32_0 : i32, i32
  }
  func.func @transform_4(%arg0: i32, %arg1: i32) -> (i32, i32) {
    %c0_i32 = arith.constant 0 : i32
    %c0_i32_0 = arith.constant 0 : i32
    %c0_i32_1 = arith.constant 0 : i32
    return %c0_i32, %c0_i32_0 : i32, i32
  }
  func.func @transform_5(%arg0: i32, %arg1: i32) -> (i32, i32) {
    %c0_i32 = arith.constant 0 : i32
    %c0_i32_0 = arith.constant 0 : i32
    %c0_i32_1 = arith.constant 0 : i32
    return %c0_i32, %c0_i32_0 : i32, i32
  }
  func.func @transform_6(%arg0: i32, %arg1: i32) -> (i32, i32) {
    %c0_i32 = arith.constant 0 : i32
    %c0_i32_0 = arith.constant 0 : i32
    %c0_i32_1 = arith.constant 0 : i32
    return %c0_i32, %c0_i32_0 : i32, i32
  }
  func.func @transform_7(%arg0: i32, %arg1: i32) -> (i32, i32, i32) {
    %c0_i32 = arith.constant 0 : i32
    %c0_i32_0 = arith.constant 0 : i32
    return %arg0, %c0_i32, %arg1 : i32, i32, i32
  }
}

</mosaic_0001>

<bundles_post_ra>
// kernel: tpu_custom_call.1
= control target key start
LH: loop header
LB: loop body
LE: loop exit
PB: predicated region body
PF: predicated region fallthrough
CT: control target
= control target key end

     0   :  { %s1111_s0 = inlined_call_operand.vmem [shape: bf16[2,8,256], index: 0, kind: input, shape index: {}]   ;;  %s1112_s1 = inlined_call_operand.vmem [shape: bf16[2,4,256], index: 1, kind: input, shape index: {}]   ;;  %s1113_s2 = inlined_call_operand.vmem [shape: bf16[16,8], index: 2, kind: input, shape index: {}]   ;;  %s1114_s3 = inlined_call_operand.vmem [shape: bf16[16,4], index: 3, kind: input, shape index: {}]   ;;  %s1115_s4 = inlined_call_operand.vmem [shape: f32[16,1], index: 4, kind: input, shape index: {}]   ;;  %s1116_s5 = inlined_call_operand.vmem [shape: f32[1,16], index: 5, kind: input, shape index: {}]   ;;  %s1117_s6 = inlined_call_operand.<no memory space> [shape: f32[1,1], index: 6, kind: input, shape index: {}]   ;;  %s1118_s7 = inlined_call_operand.hbm [shape: bf16[2,4,256], index: 7, kind: output, shape index: {}]  }
   0x1   :  { %12 = sst [smem:[#allocation2]] %s1117_s6 }
   0x2   :  { %13 = vsyncpa [#allocation4], 0 }
   0x3   :  { %15 = vsyncpa [#allocation4 + $0x1], 0  ;;  %s973_s26 = smov 0   ;;  %s975_s27 = smov 0  }
   0x4   :  { %s977_s28 = smov 0   ;;  %s979_s29 = smov 0  }
   0x5   :  { %s981_s30 = smov 0   ;;  %s983_s8 = smov 0  }
   0x6 LB: > { %s736_s6 = sadd.s32 4294967295, %s924_s8   ;;  %s737_s9 = sadd.s32 4294967294, %s924_s8   ;;  %s924_s8 = sphi %s983_s8, %s21_s8   ;;  %s920_s30 = sphi %s981_s30, %s1125_s30   ;;  %s916_s29 = sphi %s979_s29, %s1124_s29   ;;  %s912_s28 = sphi %s977_s28, %s1123_s28   ;;  %s908_s27 = sphi %s975_s27, %s1122_s27   ;;  %s904_s26 = sphi %s973_s26, %s1121_s26  }
   0x7   : > { %s33_s10 = sadd.s32 1, %s920_s30  ;;  %s203_s11 = sadd.s32 1, %s912_s28 }
   0x8   : > { %p35_p0 = scmp.ge.s32.totalorder %s33_s10, 2  ;;  %p213_p1 = scmp.ne.s32.totalorder %s912_s28, %s908_s27 }
   0x9   : > { %p214_p2 = scmp.eq.s32.totalorder %s736_s6, 1  ;;  %p219_p3 = scmp.ne.s32.totalorder %s908_s27, %s904_s26 }
   0xa   : > { %s1127_s10 = smov (%p35_p0, %s33_s10), 0  ;;  %p220_p5 = scmp.eq.s32.totalorder %s737_s9, 1 }
   0xb   : > { %p1013_p4 = por %p214_p2, %p213_p1  ;;  %s198_s13 = ssub.s32 %s920_s30, %s1127_s10 }
   0xc   : > { %p740_p6 = scmp.ge.s32.totalorder %s924_s8, 1  ;;  %p201_p7 = scmp.eq.s32.totalorder %s198_s13, 0 }
   0xd   : > { %p1020_p8 = por %p220_p5, %p219_p3  ;;  %p279_p9 = scmp.lt.s32.totalorder %s924_s8, 3 }
   0xe   : > { %s1026_s15 = scalar_select %p201_p7, %s912_s28, %s203_s11  }
   0xf   : > { %p280_p10 = pnand %p740_p6, %p279_p9 }
  0x10   : > { %p325_p11 = scmp.lt.s32.totalorder (!%p280_p10), %s916_s29, 1  ;;  %v361_v0 = vlaneseq (!%p280_p10)  ;;  %v926_v1 = vmov (!%p280_p10), 1983009808   ;;  %v927_v4 = vmov (!%p280_p10), 0   ;;  %v484_v6 = vld [vmem:[%s1115_s4] sm:$0xff] (!%p280_p10)  ;;  %v485_v8 = vld [vmem:[%s1115_s4 + $0x8] sm:$0xff] (!%p280_p10) }
  0x11   : > { %283 = sbr.rel (%p280_p10) target bundleno = 530 (0x212), region = 48  ;;  %v359_v2 = vunpack.c.l.s4 (!%p280_p10), %v926_v1  ;;  %473 = vmatprep.mubr.bf16.mxu0 (!%p280_p10), %v927_v4  ;;  %409 = vmatprep.mubr.bf16.mxu1 (!%p280_p10), %v927_v4  ;;  %vm434_vm0 = vcmask (!%p280_p10), 1043456   ;;  %vm370_vm1 = vcmask (!%p280_p10), 1041408   ;;  %v836_v17 = vld [vmem:[%s1113_s2] sm:$0xff] (!%p280_p10)   ;;  %vm430_vm2 = vcmask (!%p280_p10), 64512   ;;  %s505_s21 = sld [smem:[#allocation2]] (!%p280_p10) }
  0x12   : > { %v1030_v3 = vshrl.u32 (!%p280_p10), %v361_v0, 7  ;;  %833 = vset.pattern.permute.xlu0 (!%p280_p10), %v927_v4  ;;  %v837_v18 = vld [vmem:[%s1114_s3] sm:$0xff] (!%p280_p10)   ;;  %vm366_vm3 = vcmask (!%p280_p10), 31744   ;;  %v928_v19 = vmov (!%p280_p10), 0.0   ;;  %vm507_vm4 = vcmask (!%p280_p10), 130048   ;;  %s321_s22 = sand.u32 (!%p280_p10), 1, %s908_s27  }
  0x13   : > { %v360_v5 = vunpack.c.0.s8 (!%p280_p10), %v359_v2  ;;  %488 = vperm.xlu0 (!%p280_p10), %833, %v484_v6   ;;  %v504_v44 = vld [vmem:[%s1116_s5] sm:$0x1] (!%p280_p10)  ;;  %s766_s24 = sshll.u32 (!%p280_p10), %s916_s29, 6 }
  0x14   : > { %v597_v56 = vsub.s32 (!%p280_p10), 0, %v1030_v3  ;;  %s1064_s13 = scalar_lea.hbm (!%p280_p10), %s1118_s7, %s766_s24 }
  0x15   : > { %v363_v7 = vsub.s32 (!%p280_p10), %v360_v5, %v1030_v3 }
  0x17   : > { %493 = vperm.xlu0 (!%p280_p10), %833, %v485_v8   ;;  %v506_v45 = vstv (!%p280_p10), %s505_s21 }
  0x18   : > { %s326_s16 = scalar_select %p325_p11, %s916_s29, 1 }
  0x19   : > { %s929_s29 = smov [#allocation3]  }
  0x1a   : > { %s764_s19 = sshll.u32 %s326_s16, 3  ;;  %s765_s20 = sshll.u32 %s326_s16, 2 }
  0x1b   : > { %s332_s23 = scalar_lea.vmem %s1111_s0, %s764_s19  ;;  %s342_s6 = scalar_lea.vmem %s1112_s1, %s765_s20 }
  0x1c   : > { %v346_v9 = vld [vmem:[%s332_s23] sm:$0xff]  ;;  %s741_s23 = sshll.u32 %s321_s22, 2  ;;  %s626_s16 = scalar_lea.sflag [#allocation4], %s321_s22 }
  0x1d   : > { %v1045_v10 = vld [vmem:[%s342_s6] sm:$0xf]  ;;  %v751_v11 = vcombine.high %v346_v9, %v346_v9  ;;  %v750_v12 = vcombine.low %v346_v9, %v346_v9  ;;  %s323_s25 = scalar_lea.vmem [#allocation3], %s741_s23  ;;  %s850_s18 = sshll.u32 %s929_s29, 4  ;;  %s851_s18 = int_to_ptr.vmem [resolvable:$false] %s850_s18 }
  0x1e   : > { %v364_v13 = vrot.slane %v1045_v10, %v363_v7  ;;  %v594_v60 = vunpack.c.l.bf16 %v1045_v10  ;;  %s642_s6 = sshll.u32 %s323_s25, 4  ;;  %s852_s19 = scalar_lea.vmem %s851_s18, 128  ;;  %s1066_s6 = int_to_ptr.vmem [resolvable:$true] %s642_s6 }
  0x1f   : > { %752 = vmatprep.subr.msk.bf16.mxu0 %vm434_vm0, %v751_v11  ;;  %v436_v14 = vsel %vm434_vm0, %v750_v12, 0  ;;  %s846_s17 = scalar_lea.vmem %s1066_s6, 64  ;;  %p853_p1 = scmp.lt.s32.totalorder %s1066_s6, %s851_s18 }
  0x20   : > { %v365_v15 = vcombine.high %v364_v13, %v364_v13  ;;  %v372_v16 = vsel %vm370_vm1, %v364_v13, 0  ;;  %442 = vmatpush1.bf16.msra.mxu0 %v436_v14  ;;  %p847_p12 = scmp.ne.s32.totalorder %s1066_s6, %s846_s17  ;;  %p854_p2 = scmp.lt.s32.totalorder %s852_s19, %s846_s17 }
  0x22   : > { %747 = vmatprep.subr.msk.bf16.mxu1 %vm370_vm1, %v365_v15  ;;  %p848_p13 = pnand %p847_p12, %p1013_p4  ;;  %p855_p3 = por %p854_p2, %p853_p1 }
  0x23   : > { %378 = vmatpush1.bf16.msra.mxu1 %v372_v16  ;;  %753 = vmatmul.mubr.msk.bf16.vlgmr.msra.gmra.mrb[0].mxu0 %vm430_vm2, %v836_v17 }
  0x24   : > { %p849_p0 = pneg %p848_p13 }
  0x26   : > { %748 = vmatmul.mubr.msk.bf16.vlgmr.msra.gmra.mrb[0].mxu1 %vm366_vm3, %v837_v18  ;;  %p856_p5 = pnand %p855_p3, %p849_p0 }
  0x27   : > { %575 = vmatprep.mubr.f32.mxu1 %v928_v19 }
  0x92   : > { %v489_v20 = vpop.permute.xlu0 %488 }
  0x96   : > { %v494_v33 = vpop.permute.xlu0 %493 }
  0xf6   : > { %v475_v21 = vpop.f32.mrb[0].mxu0 }
  0xf7   : > { %v477_v22 = vpop.f32.mrb[1].mxu0 }
  0xf8   : > { %v479_v24 = vpop.f32.mrb[2].mxu0 }
  0xf9   : > { %v411_v23 = vpop.f32.mrb[0].mxu1  ;;  %v481_v27 = vpop.f32.mrb[3].mxu0 }
  0xfa   : > { %v476_v25 = vadd.f32 %v475_v21, %v411_v23  ;;  %v413_v26 = vpop.f32.mrb[1].mxu1 }
  0xfb   : > { %v478_v28 = vadd.f32 %v477_v22, %v413_v26  ;;  %v415_v29 = vpop.f32.mrb[2].mxu1 }
  0xfc   : > { %v496_v30 = vadd.f32 %v489_v20, %v476_v25  ;;  %v480_v31 = vadd.f32 %v479_v24, %v415_v29  ;;  %v417_v32 = vpop.f32.mrb[3].mxu1 }
  0xfd   : > { %v497_v34 = vadd.f32 %v489_v20, %v478_v28  ;;  %v482_v35 = vadd.f32 %v481_v27, %v417_v32 }
  0xfe   : > { %v498_v36 = vadd.f32 %v494_v33, %v480_v31  ;;  %v500_v38 = vmax.f32 %v496_v30, 0.0 }
  0xff   : > { %v499_v37 = vadd.f32 %v494_v33, %v482_v35  ;;  %v501_v40 = vmax.f32 %v497_v34, 0.0 }
 0x100   : > { %v502_v39 = vmax.f32 %v498_v36, 0.0 }
 0x101   : > { %v503_v41 = vmax.f32 %v499_v37, 0.0 }
 0x102   : > { %v769_v42 = vpack.c.bf16 %v502_v39, %v500_v38 }
 0x103   : > { %v767_v43 = vpack.c.bf16 %v503_v41, %v501_v40 }
 0x105   : > { %768 = vmatprep.subr.bf16.mxu1 %v767_v43 }
 0x106   : > { %770 = vmatpush1.bf16.msra.mxu1 %v769_v42 }
 0x109   : > { %754 = vmatmul.mubr.msk.f32.vlgmr.msra.gmra.mrb[4].mxu1 %vm507_vm4, %v504_v44 }
 0x1dc   : > { %v577_v46 = vpop.f32.mrb[4].mxu1 }
 0x1dd   : > { %v578_v47 = vadd.f32 %v577_v46, %v506_v45  ;;  %v579_v48 = vpop.f32.mrb[5].mxu1 }
 0x1de   : > { %v580_v49 = vadd.f32 %v579_v48, %v506_v45 }
 0x1df   : > { %v755_v50 = vmul.f32 -1.442695, %v578_v47 }
 0x1e0   : > { %v756_v51 = vmul.f32 -1.442695, %v580_v49 }
 0x1e1   : > { %838 = vpow2.f32 %v755_v50 }
 0x1e2   : > { %840 = vpow2.f32 %v756_v51 }
 0x1eb   : > { %v839_v52 = vpop.eup %838 }
 0x1ec   : > { %v841_v53 = vpop.eup %840  ;;  %v588_v54 = vadd.f32 1.0, %v839_v52 }
 0x1ed   : > { %v589_v55 = vadd.f32 1.0, %v841_v53 }
 0x1ee   : > { %842 = vrcp.f32 %v588_v54 }
 0x1ef   : > { %844 = vrcp.f32 %v589_v55 }
 0x1f8   : > { %v843_v57 = vpop.eup %842 }
 0x1f9   : > { %v845_v58 = vpop.eup %844  ;;  %v598_v59 = vrot.slane %v843_v57, %v597_v56 }
 0x1fa   : > { %v602_v61 = vrot.slane %v845_v58, %v597_v56 }
 0x1fc   : > { %v605_v62 = vcombine.low %v598_v59, %v602_v61 }
 0x1fe   : > { %v607_v63 = vmul.f32 %v605_v62, %v594_v60 }
 0x200   : > { %v609_v0 = vcombine.high %v607_v63, %v607_v63 }
 0x202   : > { %v757_v1 = vpack.c.bf16 %v609_v0, %v607_v63 }
 0x204   : > { %758 = vst.sshfl [vmem:[%s323_s25] sm:$0x33 pattern:$0x76325410] %v757_v1 }
 0x205   : > { %859 = shalt.err (!%p856_p5)
}
 0x206   : > { %s860_s20 = scalar_lea.hbm %s1064_s13, 64  ;;  %s864_s23 = scalar_lea.hbm %s1118_s7, 128 }
 0x207   : > { %p861_p6 = scmp.ne.s32.totalorder %s1064_s13, %s860_s20  ;;  %p865_p10 = scmp.lt.u32.totalorder %s1064_s13, %s1118_s7 }
 0x208   : > { %p866_p11 = scmp.lt.u32.totalorder %s864_s23, %s860_s20  ;;  %p868_p13 = scmp.lt.u32.totalorder %s860_s20, %s1064_s13 }
 0x209   : > { %p862_p7 = pnand %p861_p6, %p1013_p4 }
 0x20a   : > { %p867_p12 = por %p866_p11, %p865_p10 }
 0x20b   : > { %p863_p9 = pneg %p862_p7 }
 0x20c   : > { %p869_p0 = por %p868_p13, %p867_p12 }
 0x20e   : > { %p870_p1 = pnand %p869_p0, %p863_p9 }
 0x210   : > { %873 = shalt.err (!%p870_p1)
}
 0x211   : > { %775 = dma.vmem_to_hbm [thread:$0]  (%p1013_p4), %s1066_s6, 64, %s1064_s13, %s626_s16  }
 0x212 PF: > { %p781_p2 = scmp.ge.s32.totalorder %s924_s8, 2  ;;  %s654_s9 = sand.u32 1, %s904_s26  }
 0x213   : > { %s655_s11 = scalar_lea.sflag [#allocation4], %s654_s9 }
 0x214   : > { %p778_p3 = pnand %p781_p2, %p1020_p8 }
 0x216   : > { %899 = dma.done.wait (!%p778_p3), %s655_s11, 64  }
 0x217   : > { %901 = vsyncadd (!%p778_p3), %s655_s11, 4294967232  ;;  %s21_s8 = sadd.s32 1, %s924_s8   ;;  %s1121_s26 = smov %s908_s27 }
 0x218   : > { %p18_p5 = scmp.ge.s32.totalorder %s21_s8, 4   ;;  %s1122_s27 = smov %s912_s28 }
 0x219   : > { %s1123_s28 = smov %s1026_s15  ;;  %s1124_s29 = smov %s920_s30 }
 0x21a   : > { %s1125_s30 = smov %s1127_s10  ;;  %20 = sbr.rel (!%p18_p5) target bundleno = 6 (0x6), region = 86 }
 0x221   :  { %660 = vsyncpa [#allocation4], 1 }
 0x222   :  { %662 = vsyncpa [#allocation4 + $0x1], 1 }

</bundles_post_ra>
